<compile_context>
chip_gen: v7x
topology: tpu7x:2x2x1
jax: 0.10.0
libtpu: 0.0.40
codegen_flags: <defaults>
</compile_context>

<pallas_src>
import functools

import jax
import jax.numpy as jnp
import numpy as np
from jax import lax
from jax.experimental import pallas as pl
from jax.experimental.pallas import tpu as pltpu

_LANE = 128
_SUBLANE = 8
_VMEM_BUDGET_BYTES = 40 * 1024 * 1024   # block-sizing budget (fits v7x's 64 MiB VMEM)
_VMEM_LIMIT_BYTES = 48 * 1024 * 1024    # scoped VMEM requested from the compiler


def _round_up(x, m):
    return ((x + m - 1) // m) * m


def _leaky_relu(x, alpha):
    return jnp.where(x > 0, x, alpha * x)


def _elu(x):
    # elu(x) = x if x > 0 else exp(x) - 1   (default alpha=1.0, matches F.elu)
    return jnp.where(x > 0, x, jnp.exp(jnp.minimum(x, 0.0)) - 1.0)


def interaction_kernel(xm_ref, xp_ref, wm_ref, wp_ref, b2_ref,
                       om_ref, op_ref, hm_scr, hp_scr, a_scr, *,
                       alpha, block_b, n, m, fm, fp,
                       matmul_dtype, approx_recip, unroll):
    # ---- batched projections: one lane-dense MXU matmul per side ------------
    # Column `fp` of wm_ref carries W_m @ b1, so s_m rides along for free.
    xm = xm_ref[...].reshape(block_b * n, fm)          # (Bt*N, F_m)
    xp = xp_ref[...].reshape(block_b * m, fp)          # (Bt*M, F_p)
    hm_scr[...] = jnp.dot(xm, wm_ref[...], preferred_element_type=jnp.float32)
    hp_scr[...] = jnp.dot(xp, wp_ref[...], preferred_element_type=jnp.float32)

    # ---- attention / softmax, batched over the whole block ------------------
    # s_m[g,i] = h_m[g,i,:] . b1  -> folded projection column (free slice).
    s_m = hm_scr[:, fp:fp + 1].reshape(block_b, n, 1)          # (Bt, N, 1)
    # s_p[g,j] = h_p[g,j,:] . b2  -> MXU matvec, output already lane-major.
    s_p = lax.dot_general(b2_ref[...], hp_scr[...],
                          dimension_numbers=(((1,), (1,)), ((), ())),
                          preferred_element_type=jnp.float32)   # (1, Bt*M)
    s_p = s_p.reshape(block_b, 1, m)                            # (Bt, 1, M)

    e = _leaky_relu(s_m + s_p, alpha)                           # (Bt, N, M)
    e = e - jnp.max(e, axis=2, keepdims=True)
    p = jnp.exp(e)
    inv = pl.reciprocal(jnp.sum(p, axis=2, keepdims=True), approx=approx_recip)
    a_scr[...] = p * inv

    # ---- per-graph output matmuls (MXU) -------------------------------------
    def body(g, carry):
        row_m = pl.multiple_of(jnp.int32(g) * n, n)
        row_p = pl.multiple_of(jnp.int32(g) * m, m)
        a_g = a_scr[g]                                          # (N, M) f32
        h_p_g = hp_scr[pl.ds(row_p, m), :]                      # (M, Fm_pad)
        h_m_g = hm_scr[pl.ds(row_m, n), :]                      # (N, Fp_pad)
        if matmul_dtype is not None:
            a_g = a_g.astype(matmul_dtype)
            h_p_g = h_p_g.astype(matmul_dtype)
            h_m_g = h_m_g.astype(matmul_dtype)
        out_m = jnp.dot(a_g, h_p_g, preferred_element_type=jnp.float32)
        # a.T @ h_m without an explicit transpose: contract the N axis.
        out_p = lax.dot_general(a_g, h_m_g,
                                dimension_numbers=(((0,), (0,)), ((), ())),
                                preferred_element_type=jnp.float32)
        # ELU + store only the valid (un-padded) feature columns.
        om_ref[g] = _elu(out_m[:, :fm]).astype(om_ref.dtype)
        op_ref[g] = _elu(out_p[:, :fp]).astype(op_ref.dtype)
        return carry

    lax.fori_loop(0, block_b, body, None, unroll=unroll)


def _pick_block_b(B, N, M, Fm, Fp, Fm_pad, Fp_pad, in_bytes,
                  vmem_budget=_VMEM_BUDGET_BYTES, min_steps=2):
    """Largest divisor of B fitting the VMEM budget while keeping >= min_steps
    grid steps (pipeline overlap; both v7x TensorCores busy), preferring an
    even number of grid steps for the v7x 2-core split."""
    def vmem_bytes(bb):
        inp = 2 * bb * (N * Fm + M * Fp) * in_bytes            # double-buffered inputs
        out = 2 * bb * (N * Fm + M * Fp) * 4                   # double-buffered f32 outputs
        wts = 2 * ((Fm * Fp_pad + Fp * Fm_pad) * in_bytes + Fm_pad * 4)
        scr = bb * (N * Fp_pad + M * Fm_pad + N * M) * 4       # h_m / h_p / attention scratch
        return int(1.3 * (inp + out + wts + scr))              # ~30% headroom

    divisors = [d for d in range(1, B + 1) if B % d == 0]
    fits = [d for d in divisors if vmem_bytes(d) <= vmem_budget] or [1]
    pipelined = [d for d in fits if B // d >= min_steps]
    if pipelined:
        even = [d for d in pipelined if (B // d) % 2 == 0]
        return max(even) if even else max(pipelined)
    return max(fits)


def interaction_forward(x_m, x_p, W_m, W_p, b, alpha, *,
                        block_b=None, matmul_dtype=None, approx_recip=True):
    """Pallas implementation of Interaction.forward.

    x_m : (B, N, F_m)   x_p : (B, M, F_p)
    W_m : (F_m, F_p)    W_p : (F_p, F_m)    b : (F_m + F_p, 1)
    matmul_dtype: None (f32 MXU) or jnp.bfloat16 (bf16 operands DMA'd as bf16,
                  f32 accumulation; bf16-native MXU path on v5e/v6e/v7x).
    returns (out_m: (B, N, F_m), out_p: (B, M, F_p)), float32.
    """
    B, N, Fm = x_m.shape
    Bp, M, Fp = x_p.shape
    assert Bp == B
    assert W_m.shape == (Fm, Fp) and W_p.shape == (Fp, Fm)
    assert b.shape == (Fm + Fp, 1)
    # f32 sublane tile is 8: keeps in-kernel reshapes / row slices tile-aligned.
    assert N % _SUBLANE == 0 and M % _SUBLANE == 0, "N and M must be multiples of 8"
    # TODO(synk): pad ragged N / M up to 8 and mask padded M columns to -inf
    # before the softmax (padded N rows are harmless since their h_m rows are 0).

    f32 = jnp.float32
    in_dtype = f32 if matmul_dtype is None else jnp.dtype(matmul_dtype)
    in_bytes = jnp.dtype(in_dtype).itemsize

    # One spare padded column (index Fp) of W_m carries W_m @ b1, so the logit
    # s_m = h_m . b1 is produced by the projection matmul itself.
    Fp_pad = _round_up(Fp + 1, _LANE)
    Fm_pad = _round_up(Fm, _LANE)

    b1 = b[:Fp, 0].astype(f32)
    b2 = b[Fp:, 0].astype(f32)
    W_m_ext = jnp.zeros((Fm, Fp_pad), f32).at[:, :Fp].set(W_m.astype(f32))
    W_m_ext = W_m_ext.at[:, Fp].set(
        jnp.dot(W_m.astype(f32), b1, precision=lax.Precision.HIGHEST))
    W_p_ext = jnp.zeros((Fp, Fm_pad), f32).at[:, :Fm].set(W_p.astype(f32))
    b2_row = jnp.zeros((1, Fm_pad), f32).at[0, :Fm].set(b2)

    if block_b is None:
        block_b = _pick_block_b(B, N, M, Fm, Fp, Fm_pad, Fp_pad, in_bytes)
    assert B % block_b == 0, "block_b must divide B"

    if block_b <= 4:
        unroll = True
    elif block_b % 2 == 0:
        unroll = 2
    else:
        unroll = 1

    kernel = functools.partial(
        interaction_kernel, alpha=float(alpha), block_b=block_b, n=N, m=M,
        fm=Fm, fp=Fp, matmul_dtype=matmul_dtype, approx_recip=approx_recip,
        unroll=unroll)

    grid_spec = pltpu.PrefetchScalarGridSpec(
        num_scalar_prefetch=0,
        grid=(B // block_b,),
        in_specs=[
            pl.BlockSpec((block_b, N, Fm), lambda i: (i, 0, 0)),
            pl.BlockSpec((block_b, M, Fp), lambda i: (i, 0, 0)),
            pl.BlockSpec((Fm, Fp_pad), lambda i: (0, 0)),
            pl.BlockSpec((Fp, Fm_pad), lambda i: (0, 0)),
            pl.BlockSpec((1, Fm_pad), lambda i: (0, 0)),
        ],
        out_specs=[
            pl.BlockSpec((block_b, N, Fm), lambda i: (i, 0, 0)),
            pl.BlockSpec((block_b, M, Fp), lambda i: (i, 0, 0)),
        ],
        scratch_shapes=[
            pltpu.VMEM((block_b * N, Fp_pad), f32),   # h_m (+ folded s_m column)
            pltpu.VMEM((block_b * M, Fm_pad), f32),   # h_p
            pltpu.VMEM((block_b, N, M), f32),         # attention
        ],
    )

    out_m, out_p = pl.pallas_call(
        kernel,
        out_shape=(
            jax.ShapeDtypeStruct((B, N, Fm), f32),
            jax.ShapeDtypeStruct((B, M, Fp), f32),
        ),
        grid_spec=grid_spec,
        compiler_params=pltpu.CompilerParams(
            dimension_semantics=("parallel",),
            vmem_limit_bytes=_VMEM_LIMIT_BYTES),
    )(x_m.astype(in_dtype), x_p.astype(in_dtype),
      W_m_ext.astype(in_dtype), W_p_ext.astype(in_dtype), b2_row)

    return out_m, out_p


def interaction_reference(x_m, x_p, W_m, W_p, b, alpha):
    """Pure-JAX reference matching the PyTorch forward exactly."""
    Fp = W_p.shape[0]
    h_m = jnp.einsum("bnf,fp->bnp", x_m, W_m)          # (B, N, F_p)
    h_p = jnp.einsum("bmf,fp->bmp", x_p, W_p)          # (B, M, F_m)
    b1 = b[:Fp, 0]
    b2 = b[Fp:, 0]
    e = (h_m @ b1)[:, :, None] + (h_p @ b2)[:, None, :]   # (B, N, M)
    e = jnp.where(e > 0, e, alpha * e)
    a = jax.nn.softmax(e, axis=2)
    out_m = jax.nn.elu(jnp.einsum("bnm,bmf->bnf", a, h_p))
    out_p = jax.nn.elu(jnp.einsum("bnm,bnf->bmf", a, h_m))
    return out_m, out_p


if __name__ == "__main__":
    B, N, M = 2, 8, 8
    F_m, F_p = 32, 32
    alpha = 0.2

    key = jax.random.PRNGKey(0)
    k1, k2, k3, k4, k5 = jax.random.split(key, 5)

    # Deterministic nonzero parameter init (module's __init__ only fixes shapes).
    W_m = 0.1 * jax.random.normal(k1, (F_m, F_p), dtype=jnp.float32)
    W_p = 0.1 * jax.random.normal(k2, (F_p, F_m), dtype=jnp.float32)
    b = 0.1 * jax.random.normal(k3, (F_m + F_p, 1), dtype=jnp.float32)

    x_m = jax.random.normal(k4, (B, N, F_m), dtype=jnp.float32)
    x_p = jax.random.normal(k5, (B, M, F_p), dtype=jnp.float32)

    ref_m, ref_p = interaction_reference(x_m, x_p, W_m, W_p, b, alpha)

    # Full-precision MXU path: tight check against the f32 reference.
    out_m, out_p = interaction_forward(x_m, x_p, W_m, W_p, b, alpha,
                                       matmul_dtype=None, approx_recip=False)
    jax.block_until_ready((out_m, out_p))
    np.testing.assert_allclose(np.asarray(out_m), np.asarray(ref_m), rtol=1e-4, atol=1e-4)
    np.testing.assert_allclose(np.asarray(out_p), np.asarray(ref_p), rtol=1e-4, atol=1e-4)

    # bf16-operand / f32-accumulate fast path (bf16 DMA): looser tolerance.
    out_m16, out_p16 = interaction_forward(x_m, x_p, W_m, W_p, b, alpha,
                                           matmul_dtype=jnp.bfloat16,
                                           approx_recip=True)
    jax.block_until_ready((out_m16, out_p16))
    np.testing.assert_allclose(np.asarray(out_m16), np.asarray(ref_m), rtol=3e-2, atol=3e-2)
    np.testing.assert_allclose(np.asarray(out_p16), np.asarray(ref_p), rtol=3e-2, atol=3e-2)

    print("KERNEL_OK")
</pallas_src>

<mosaic_0001>
module attributes {stable_mosaic.version = 11 : i64} {
  func.func @interaction_kernel(%arg0: i32, %arg1: memref<1x8x32xf32, #tpu.memory_space<vmem>>, %arg2: memref<1x8x32xf32, #tpu.memory_space<vmem>>, %arg3: memref<32x128xf32, #tpu.memory_space<vmem>>, %arg4: memref<32x128xf32, #tpu.memory_space<vmem>>, %arg5: memref<1x128xf32, #tpu.memory_space<vmem>>, %arg6: memref<1x8x32xf32, #tpu.memory_space<vmem>>, %arg7: memref<1x8x32xf32, #tpu.memory_space<vmem>>, %arg8: memref<8x128xf32, #tpu.memory_space<vmem>>, %arg9: memref<8x128xf32, #tpu.memory_space<vmem>>, %arg10: memref<1x8x8xf32, #tpu.memory_space<vmem>>) attributes {dimension_semantics = [#tpu.dimension_semantics<parallel>], iteration_bounds = array<i64: 2>, scalar_prefetch = 0 : i64, scratch_operands = 3 : i64, tpu.core_type = #tpu.core_type<tc>, window_params = [{transform_indices = @transform_0, window_bounds = array<i64: 1, 8, 32>}, {transform_indices = @transform_1, window_bounds = array<i64: 1, 8, 32>}, {pipeline_mode = #tpu.pipeline_mode<synchronous>, transform_indices = @transform_2, window_bounds = array<i64: 32, 128>}, {pipeline_mode = #tpu.pipeline_mode<synchronous>, transform_indices = @transform_3, window_bounds = array<i64: 32, 128>}, {pipeline_mode = #tpu.pipeline_mode<synchronous>, transform_indices = @transform_4, window_bounds = array<i64: 1, 128>}, {transform_indices = @transform_5, window_bounds = array<i64: 1, 8, 32>}, {transform_indices = @transform_6, window_bounds = array<i64: 1, 8, 32>}]} {
    %c0 = arith.constant 0 : index
    %c0_0 = arith.constant 0 : index
    %c0_1 = arith.constant 0 : index
    %0 = vector.load %arg1[%c0, %c0_0, %c0_1] : memref<1x8x32xf32, #tpu.memory_space<vmem>>, vector<1x8x32xf32>
    %1 = vector.shape_cast %0 : vector<1x8x32xf32> to vector<8x32xf32>
    %c0_2 = arith.constant 0 : index
    %c0_3 = arith.constant 0 : index
    %c0_4 = arith.constant 0 : index
    %2 = vector.load %arg2[%c0_2, %c0_3, %c0_4] : memref<1x8x32xf32, #tpu.memory_space<vmem>>, vector<1x8x32xf32>
    %3 = vector.shape_cast %2 : vector<1x8x32xf32> to vector<8x32xf32>
    %c0_5 = arith.constant 0 : index
    %c0_6 = arith.constant 0 : index
    %4 = vector.load %arg3[%c0_5, %c0_6] : memref<32x128xf32, #tpu.memory_space<vmem>>, vector<32x128xf32>
    %cst = arith.constant dense<0.000000e+00> : vector<8x128xf32>
    %5 = tpu.matmul %1, %4, %cst {dimension_numbers = #tpu.dot_dimension_numbers<[1], [0], [0], [1], [0, 0, 1, 1], [], []>} : vector<8x32xf32>, vector<32x128xf32>, vector<8x128xf32> -> vector<8x128xf32>
    %c0_7 = arith.constant 0 : index
    %c0_8 = arith.constant 0 : index
    %6 = vector.load %arg8[%c0_7, %c0_8] : memref<8x128xf32, #tpu.memory_space<vmem>>, vector<8x128xf32>
    tpu.vector_store %arg8[%c0_7, %c0_8], %5 {strides = array<i32>} : memref<8x128xf32, #tpu.memory_space<vmem>>, vector<8x128xf32>,
    %c0_9 = arith.constant 0 : index
    %c0_10 = arith.constant 0 : index
    %7 = vector.load %arg4[%c0_9, %c0_10] : memref<32x128xf32, #tpu.memory_space<vmem>>, vector<32x128xf32>
    %cst_11 = arith.constant dense<0.000000e+00> : vector<8x128xf32>
    %8 = tpu.matmul %3, %7, %cst_11 {dimension_numbers = #tpu.dot_dimension_numbers<[1], [0], [0], [1], [0, 0, 1, 1], [], []>} : vector<8x32xf32>, vector<32x128xf32>, vector<8x128xf32> -> vector<8x128xf32>
    %c0_12 = arith.constant 0 : index
    %c0_13 = arith.constant 0 : index
    %9 = vector.load %arg9[%c0_12, %c0_13] : memref<8x128xf32, #tpu.memory_space<vmem>>, vector<8x128xf32>
    tpu.vector_store %arg9[%c0_12, %c0_13], %8 {strides = array<i32>} : memref<8x128xf32, #tpu.memory_space<vmem>>, vector<8x128xf32>,
    %c0_14 = arith.constant 0 : index
    %c32 = arith.constant 32 : index
    %10 = vector.load %arg8[%c0_14, %c32] : memref<8x128xf32, #tpu.memory_space<vmem>>, vector<8x1xf32>
    %11 = vector.shape_cast %10 : vector<8x1xf32> to vector<1x8x1xf32>
    %c0_15 = arith.constant 0 : index
    %c0_16 = arith.constant 0 : index
    %12 = vector.load %arg5[%c0_15, %c0_16] : memref<1x128xf32, #tpu.memory_space<vmem>>, vector<1x128xf32>
    %c0_17 = arith.constant 0 : index
    %c0_18 = arith.constant 0 : index
    %13 = vector.load %arg9[%c0_17, %c0_18] : memref<8x128xf32, #tpu.memory_space<vmem>>, vector<8x128xf32>
    %cst_19 = arith.constant dense<0.000000e+00> : vector<1x8xf32>
    %14 = tpu.matmul %12, %13, %cst_19 {dimension_numbers = #tpu.dot_dimension_numbers<[1], [1], [0], [0], [0, 0, 1, 0], [], []>} : vector<1x128xf32>, vector<8x128xf32>, vector<1x8xf32> -> vector<1x8xf32>
    %15 = vector.shape_cast %14 : vector<1x8xf32> to vector<1x1x8xf32>
    %16 = vector.broadcast %11 : vector<1x8x1xf32> to vector<1x8x8xf32>
    %17 = vector.broadcast %15 : vector<1x1x8xf32> to vector<1x8x8xf32>
    %18 = arith.addf %16, %17 : vector<1x8x8xf32>
    %cst_20 = arith.constant 0.000000e+00 : f32
    %19 = vector.broadcast %cst_20 : f32 to vector<1x8x8xf32>
    %20 = arith.cmpf ogt, %18, %19 : vector<1x8x8xf32>
    %cst_21 = arith.constant 2.000000e-01 : f32
    %21 = vector.broadcast %cst_21 : f32 to vector<1x8x8xf32>
    %22 = arith.mulf %21, %18 : vector<1x8x8xf32>
    %23 = arith.select %20, %18, %22 : vector<1x8x8xi1>, vector<1x8x8xf32>
    %cst_22 = arith.constant dense<0xFF800000> : vector<1x8xf32>
    %24 = vector.multi_reduction <maximumf>, %23, %cst_22 [2] : vector<1x8x8xf32> to vector<1x8xf32>
    %25 = vector.shape_cast %24 : vector<1x8xf32> to vector<1x8x1xf32>
    %26 = vector.broadcast %25 : vector<1x8x1xf32> to vector<1x8x8xf32>
    %27 = arith.subf %23, %26 : vector<1x8x8xf32>
    %28 = math.exp %27 : vector<1x8x8xf32>
    %cst_23 = arith.constant dense<0.000000e+00> : vector<1x8xf32>
    %29 = vector.multi_reduction <add>, %28, %cst_23 [2] : vector<1x8x8xf32> to vector<1x8xf32>
    %30 = vector.shape_cast %29 : vector<1x8xf32> to vector<1x8x1xf32>
    %31 = tpu.reciprocal %30 : vector<1x8x1xf32> -> vector<1x8x1xf32>
    %32 = vector.broadcast %31 : vector<1x8x1xf32> to vector<1x8x8xf32>
    %33 = arith.mulf %28, %32 : vector<1x8x8xf32>
    %c0_24 = arith.constant 0 : index
    %c0_25 = arith.constant 0 : index
    %c0_26 = arith.constant 0 : index
    %34 = vector.load %arg10[%c0_24, %c0_25, %c0_26] : memref<1x8x8xf32, #tpu.memory_space<vmem>>, vector<1x8x8xf32>
    tpu.vector_store %arg10[%c0_24, %c0_25, %c0_26], %33 {strides = array<i32>} : memref<1x8x8xf32, #tpu.memory_space<vmem>>, vector<1x8x8xf32>,
    %c0_i32 = arith.constant 0 : i32
    %c8_i32 = arith.constant 8 : i32
    %35 = arith.muli %c0_i32, %c8_i32 : i32
    %36 = tpu.assume_multiple %35, 8 : i32
    %c8_i32_27 = arith.constant 8 : i32
    %37 = arith.muli %c0_i32, %c8_i32_27 : i32
    %38 = tpu.assume_multiple %37, 8 : i32
    %39 = arith.index_cast %c0_i32 : i32 to index
    %c0_28 = arith.constant 0 : index
    %c0_29 = arith.constant 0 : index
    %40 = vector.load %arg10[%39, %c0_28, %c0_29] : memref<1x8x8xf32, #tpu.memory_space<vmem>>, vector<1x8x8xf32>
    %41 = vector.shape_cast %40 : vector<1x8x8xf32> to vector<8x8xf32>
    %42 = arith.index_cast %38 : i32 to index
    %c0_30 = arith.constant 0 : index
    %43 = vector.load %arg9[%42, %c0_30] : memref<8x128xf32, #tpu.memory_space<vmem>>, vector<8x128xf32>
    %44 = arith.index_cast %36 : i32 to index
    %c0_31 = arith.constant 0 : index
    %45 = vector.load %arg8[%44, %c0_31] : memref<8x128xf32, #tpu.memory_space<vmem>>, vector<8x128xf32>
    %cst_32 = arith.constant dense<0.000000e+00> : vector<8x128xf32>
    %46 = tpu.matmul %41, %43, %cst_32 {dimension_numbers = #tpu.dot_dimension_numbers<[1], [0], [0], [1], [0, 0, 1, 1], [], []>} : vector<8x8xf32>, vector<8x128xf32>, vector<8x128xf32> -> vector<8x128xf32>
    %cst_33 = arith.constant dense<0.000000e+00> : vector<8x128xf32>
    %47 = tpu.matmul %41, %45, %cst_33 {dimension_numbers = #tpu.dot_dimension_numbers<[0], [0], [1], [1], [0, 1, 1, 1], [], []>} : vector<8x8xf32>, vector<8x128xf32>, vector<8x128xf32> -> vector<8x128xf32>
    %48 = vector.extract_strided_slice %46 {offsets = [0, 0], sizes = [8, 32], strides = [1, 1]} : vector<8x128xf32> to vector<8x32xf32>
    %cst_34 = arith.constant 0.000000e+00 : f32
    %49 = vector.broadcast %cst_34 : f32 to vector<8x32xf32>
    %50 = arith.cmpf ogt, %48, %49 : vector<8x32xf32>
    %cst_35 = arith.constant 0.000000e+00 : f32
    %51 = vector.broadcast %cst_35 : f32 to vector<8x32xf32>
    %52 = arith.minimumf %48, %51 : vector<8x32xf32>
    %53 = math.exp %52 : vector<8x32xf32>
    %cst_36 = arith.constant 1.000000e+00 : f32
    %54 = vector.broadcast %cst_36 : f32 to vector<8x32xf32>
    %55 = arith.subf %53, %54 : vector<8x32xf32>
    %56 = arith.select %50, %48, %55 : vector<8x32xi1>, vector<8x32xf32>
    %57 = arith.index_cast %c0_i32 : i32 to index
    %c0_37 = arith.constant 0 : index
    %c0_38 = arith.constant 0 : index
    %58 = vector.load %arg6[%57, %c0_37, %c0_38] : memref<1x8x32xf32, #tpu.memory_space<vmem>>, vector<1x8x32xf32>
    %59 = vector.shape_cast %58 : vector<1x8x32xf32> to vector<8x32xf32>
    %60 = vector.shape_cast %56 : vector<8x32xf32> to vector<1x8x32xf32>
    tpu.vector_store %arg6[%57, %c0_37, %c0_38], %60 {strides = array<i32>} : memref<1x8x32xf32, #tpu.memory_space<vmem>>, vector<1x8x32xf32>,
    %61 = vector.extract_strided_slice %47 {offsets = [0, 0], sizes = [8, 32], strides = [1, 1]} : vector<8x128xf32> to vector<8x32xf32>
    %cst_39 = arith.constant 0.000000e+00 : f32
    %62 = vector.broadcast %cst_39 : f32 to vector<8x32xf32>
    %63 = arith.cmpf ogt, %61, %62 : vector<8x32xf32>
    %cst_40 = arith.constant 0.000000e+00 : f32
    %64 = vector.broadcast %cst_40 : f32 to vector<8x32xf32>
    %65 = arith.minimumf %61, %64 : vector<8x32xf32>
    %66 = math.exp %65 : vector<8x32xf32>
    %cst_41 = arith.constant 1.000000e+00 : f32
    %67 = vector.broadcast %cst_41 : f32 to vector<8x32xf32>
    %68 = arith.subf %66, %67 : vector<8x32xf32>
    %69 = arith.select %63, %61, %68 : vector<8x32xi1>, vector<8x32xf32>
    %70 = arith.index_cast %c0_i32 : i32 to index
    %c0_42 = arith.constant 0 : index
    %c0_43 = arith.constant 0 : index
    %71 = vector.load %arg7[%70, %c0_42, %c0_43] : memref<1x8x32xf32, #tpu.memory_space<vmem>>, vector<1x8x32xf32>
    %72 = vector.shape_cast %71 : vector<1x8x32xf32> to vector<8x32xf32>
    %73 = vector.shape_cast %69 : vector<8x32xf32> to vector<1x8x32xf32>
    tpu.vector_store %arg7[%70, %c0_42, %c0_43], %73 {strides = array<i32>} : memref<1x8x32xf32, #tpu.memory_space<vmem>>, vector<1x8x32xf32>,
    %c1_i32 = arith.constant 1 : i32
    return
  }
  func.func @transform_0(%arg0: i32) -> (i32, i32, i32) {
    %c0_i32 = arith.constant 0 : i32
    %c0_i32_0 = arith.constant 0 : i32
    %c0_i32_1 = arith.constant 0 : i32
    return %arg0, %c0_i32, %c0_i32_0 : i32, i32, i32
  }
  func.func @transform_1(%arg0: i32) -> (i32, i32, i32) {
    %c0_i32 = arith.constant 0 : i32
    %c0_i32_0 = arith.constant 0 : i32
    %c0_i32_1 = arith.constant 0 : i32
    return %arg0, %c0_i32, %c0_i32_0 : i32, i32, i32
  }
  func.func @transform_2(%arg0: i32) -> (i32, i32) {
    %c0_i32 = arith.constant 0 : i32
    %c0_i32_0 = arith.constant 0 : i32
    %c0_i32_1 = arith.constant 0 : i32
    return %c0_i32, %c0_i32_0 : i32, i32
  }
  func.func @transform_3(%arg0: i32) -> (i32, i32) {
    %c0_i32 = arith.constant 0 : i32
    %c0_i32_0 = arith.constant 0 : i32
    %c0_i32_1 = arith.constant 0 : i32
    return %c0_i32, %c0_i32_0 : i32, i32
  }
  func.func @transform_4(%arg0: i32) -> (i32, i32) {
    %c0_i32 = arith.constant 0 : i32
    %c0_i32_0 = arith.constant 0 : i32
    %c0_i32_1 = arith.constant 0 : i32
    return %c0_i32, %c0_i32_0 : i32, i32
  }
  func.func @transform_5(%arg0: i32) -> (i32, i32, i32) {
    %c0_i32 = arith.constant 0 : i32
    %c0_i32_0 = arith.constant 0 : i32
    %c0_i32_1 = arith.constant 0 : i32
    return %arg0, %c0_i32, %c0_i32_0 : i32, i32, i32
  }
  func.func @transform_6(%arg0: i32) -> (i32, i32, i32) {
    %c0_i32 = arith.constant 0 : i32
    %c0_i32_0 = arith.constant 0 : i32
    %c0_i32_1 = arith.constant 0 : i32
    return %arg0, %c0_i32, %c0_i32_0 : i32, i32, i32
  }
}

</mosaic_0001>

<bundles_post_ra>
// kernel: tpu_custom_call.1
= control target key start
LH: loop header
LB: loop body
LE: loop exit
PB: predicated region body
PF: predicated region fallthrough
CT: control target
= control target key end

     0   :  { %s1756_s0 = inlined_call_operand.hbm [shape: f32[2,8,32], index: 0, kind: input, shape index: {}]   ;;  %s1757_s1 = inlined_call_operand.hbm [shape: f32[2,8,32], index: 1, kind: input, shape index: {}]   ;;  %s1758_s2 = inlined_call_operand.hbm [shape: f32[32,128], index: 2, kind: input, shape index: {}]   ;;  %s1759_s3 = inlined_call_operand.hbm [shape: f32[32,128], index: 3, kind: input, shape index: {}]   ;;  %s1760_s4 = inlined_call_operand.vmem [shape: f32[1,128], index: 4, kind: input, shape index: {}]   ;;  %s1761_s5 = inlined_call_operand.hbm [shape: f32[2,8,32], index: 5, kind: output, shape index: {0}]   ;;  %s1762_s6 = inlined_call_operand.hbm [shape: f32[2,8,32], index: 6, kind: output, shape index: {1}]  }
   0x1   :  { %1767 = sst [smem:[#allocation23_spill]] %s1758_s2 }
   0x2   :  { %1768 = sst [smem:[#allocation24_spill]] %s1759_s3 }
   0x3   :  { %12 = vsyncpa [#allocation6], 0 }
   0x4   :  { %14 = vsyncpa [#allocation6 + $0x1], 0 }
   0x5   :  { %15 = vsyncpa [#allocation9], 0 }
   0x6   :  { %17 = vsyncpa [#allocation9 + $0x1], 0 }
   0x7   :  { %18 = vsyncpa [#allocation12], 0 }
   0x8   :  { %19 = vsyncpa [#allocation7], 0 }
   0x9   :  { %21 = vsyncpa [#allocation7 + $0x1], 0 }
   0xa   :  { %22 = vsyncpa [#allocation15], 0 }
   0xb   :  { %24 = vsyncpa [#allocation15 + $0x1], 0  ;;  %s1433_s21 = smov 0   ;;  %s1435_s22 = smov 0  }
   0xc   :  { %s1437_s23 = smov 0   ;;  %s1439_s24 = smov 0  }
   0xd LB: > { %s1454_s25 = sadd.s32 4294967295, %s1384_s24   ;;  %s973_s26 = sadd.s32 4294967294, %s1384_s24   ;;  %s1384_s24 = sphi %s1439_s24, %s1792_s24   ;;  %s1380_s23 = sphi %s1437_s23, %s1791_s23   ;;  %s1376_s22 = sphi %s1435_s22, %s1790_s22   ;;  %s1372_s21 = sphi %s1433_s21, %s1789_s21  }
   0xe   : > { %p50_p0 = scmp.ne.s32.totalorder %s1376_s22, %s1372_s21  ;;  %p1763_p1 = scmp.eq.s32.totalorder %s1454_s25, 0 }
   0xf   : > { %p169_p3 = scmp.eq.s32.totalorder %s973_s26, 1  ;;  %p974_p5 = scmp.ge.s32.totalorder %s1384_s24, 1 }
  0x10   : > { %p1463_p4 = por %p1763_p1, %p50_p0  ;;  %p202_p7 = scmp.lt.s32.totalorder %s1384_s24, 3 }
  0x11   : > { %p1468_p6 = por %p169_p3, %p50_p0  ;;  %s1386_s30 = smov [#allocation10]  }
  0x12   : > { %s1769_s27 = scalar_select %p1463_p4, 1, 0 }
  0x13   : > { %s1770_s28 = scalar_select %p1468_p6, 1, 0 }
  0x14   : > { %p1473_p8 = pnand %p974_p5, %p202_p7  ;;  %s214_s7 = sshll.u32 %s1386_s30, 4  ;;  %s1477_s7 = int_to_ptr.vmem [resolvable:$true] %s214_s7 }
  0x15   : > { %s1387_s9 = smov [#allocation11]   ;;  %s1773_s2 = sld [smem:[#allocation23_spill]] }
  0x16   : > { %s1771_s29 = scalar_select %p1473_p8, 1, 0 }
  0x17   : > { %p1082_p9 = pneg %p1473_p8  ;;  %s227_s10 = sshll.u32 %s1387_s9, 4  ;;  %s1488_s10 = int_to_ptr.vmem [resolvable:$true] %s227_s10 }
  0x19   : > { %p1484_p11 = pnand %p1082_p9, %p1763_p1 }
  0x1b   : > { %s1158_s13 = scalar_lea.hbm %s1773_s2, 512  ;;  %p1160_p13 = pneg %p1484_p11 }
  0x1c   : > { %p1159_p12 = scmp.ne.s32.totalorder %s1773_s2, %s1158_s13  ;;  %p1165_p5 = scmp.lt.u32.totalorder %s1158_s13, %s1773_s2 }
  0x1e   : > { %p1161_p0 = pnand %p1160_p13, %p1159_p12 }
  0x20   : > { %p1162_p3 = pneg %p1161_p0 }
  0x22   : > { %p1167_p7 = pnand %p1165_p5, %p1162_p3 }
  0x24   : > { %1170 = shalt.err (!%p1167_p7)
}
  0x25   : > { %s1171_s18 = scalar_lea.vmem %s1477_s7, 512  ;;  %p1179_p2 = scmp.lt.s32.totalorder %s1477_s7, %s1477_s7 }
  0x26   : > { %p1172_p9 = scmp.ne.s32.totalorder %s1477_s7, %s1171_s18  ;;  %p1180_p12 = scmp.lt.s32.totalorder %s1171_s18, %s1171_s18 }
  0x28   : > { %p1174_p10 = pnand %p1172_p9, %p1160_p13  ;;  %p1181_p0 = por %p1180_p12, %p1179_p2 }
  0x2a   : > { %p1175_p1 = pneg %p1174_p10 }
  0x2c   : > { %p1182_p6 = pnand %p1181_p0, %p1175_p1 }
  0x2e   : > { %1185 = shalt.err (!%p1182_p6)
}
  0x2f   : > { %s1388_s19 = smov 128   ;;  %s1389_s20 = smov 8  }
  0x30   : > { %1085 = dma.hbm_to_vmem [thread:$0]  (!%p1484_p11), %s1773_s2, 512, %s1477_s7, [#allocation9], %s1388_s19, %s1388_s19, %s1389_s20  }
  0x31   : > { %s1774_s3 = sld [smem:[#allocation24_spill]] }
  0x37   : > { %s1186_s12 = scalar_lea.hbm %s1774_s3, 512 }
  0x38   : > { %p1187_p2 = scmp.ne.s32.totalorder %s1774_s3, %s1186_s12  ;;  %p1193_p10 = scmp.lt.u32.totalorder %s1186_s12, %s1774_s3 }
  0x3a   : > { %p1189_p1 = pnand %p1187_p2, %p1160_p13 }
  0x3c   : > { %p1190_p6 = pneg %p1189_p1 }
  0x3e   : > { %p1195_p3 = pnand %p1193_p10, %p1190_p6 }
  0x40   : > { %1198 = shalt.err (!%p1195_p3)
}
  0x41   : > { %s1199_s7 = scalar_lea.vmem %s1488_s10, 512  ;;  %p1207_p12 = scmp.lt.s32.totalorder %s1488_s10, %s1488_s10 }
  0x42   : > { %p1200_p5 = scmp.ne.s32.totalorder %s1488_s10, %s1199_s7  ;;  %p1208_p0 = scmp.lt.s32.totalorder %s1199_s7, %s1199_s7 }
  0x44   : > { %p1202_p7 = pnand %p1200_p5, %p1160_p13  ;;  %p1209_p2 = por %p1208_p0, %p1207_p12 }
  0x46   : > { %p1203_p9 = pneg %p1202_p7 }
  0x48   : > { %p1210_p1 = pnand %p1209_p2, %p1203_p9 }
  0x4a   : > { %1213 = shalt.err (!%p1210_p1)
}
  0x4b   : > { %1088 = dma.hbm_to_vmem [thread:$0]  (!%p1484_p11), %s1774_s3, 512, %s1488_s10, [#allocation12], %s1388_s19, %s1388_s19, %s1389_s20  }
  0x4c   : > { %s1543_s26 = sadd.s32 1, %s1384_s24   ;;  %s37_s8 = sadd.s32 1, %s1380_s23 }
  0x4d   : > { %s34_s30 = ssub.s32 %s1384_s24, %s1543_s26  ;;  %p44_p13 = scmp.ne.s32.totalorder %s1380_s23, %s1376_s22 }
  0x4e   : > { %p35_p6 = scmp.eq.s32.totalorder %s34_s30, 0  ;;  %p45_p10 = scmp.eq.s32.totalorder %s1384_s24, 0 }
  0x4f   : > { %p1775_p3 = scmp.eq.s32.totalorder %s1454_s25, 1  ;;  %p1105_p7 = scmp.lt.s32.totalorder %s1384_s24, 2 }
  0x50   : > { %s1559_s11 = scalar_select %p35_p6, %s1380_s23, %s37_s8  }
  0x51   : > { %p1553_p5 = por %p1775_p3, %p44_p13  ;;  %p46_p9 = por %p45_p10, %p44_p13 }
  0x52   : > { %1777 = sst [smem:[#allocation22_spill]] %s1559_s11  ;;  %s244_s12 = sand.u32 1, %s1380_s23  }
  0x53   : > { %s1776_s9 = scalar_select %p1553_p5, 1, 0 }
  0x54   : > { %s1562_s10 = sshll.u32 %s244_s12, 3  ;;  %s979_s19 = sshll.u32 %s1384_s24, 7 }
  0x55   : > { %s1568_s14 = scalar_lea.hbm %s1756_s0, %s979_s19  ;;  %s248_s15 = scalar_lea.vmem [#allocation5], %s1562_s10 }
  0x56   : > { %s255_s16 = sshll.u32 %s248_s15, 4  ;;  %p1573_p11 = pnand %p1105_p7, %p46_p9  ;;  %s1571_s16 = int_to_ptr.vmem [resolvable:$true] %s255_s16 }
  0x57   : > { %s1580_s8 = scalar_lea.hbm %s1757_s1, %s979_s19  ;;  %s262_s30 = sand.u32 1, %s1384_s24  }
  0x58   : > { %s245_s20 = scalar_lea.sflag [#allocation6], %s244_s12  ;;  %s1214_s13 = scalar_lea.hbm %s1568_s14, 128 }
  0x59   : > { %p1215_p12 = scmp.ne.s32.totalorder %s1568_s14, %s1214_s13  ;;  %p1216_p0 = pneg %p1573_p11 }
  0x5a   : > { %s1219_s3 = scalar_lea.hbm %s1756_s0, 256  ;;  %p1220_p13 = scmp.lt.u32.totalorder %s1568_s14, %s1756_s0 }
  0x5b   : > { %p1217_p2 = pnand %p1216_p0, %p1215_p12  ;;  %p1221_p6 = scmp.lt.u32.totalorder %s1219_s3, %s1214_s13 }
  0x5c   : > { %p1223_p3 = scmp.lt.u32.totalorder %s1214_s13, %s1568_s14 }
  0x5d   : > { %p1218_p1 = pneg %p1217_p2  ;;  %p1222_p10 = por %p1221_p6, %p1220_p13 }
  0x5f   : > { %p1224_p7 = por %p1223_p3, %p1222_p10 }
  0x61   : > { %p1225_p9 = pnand %p1224_p7, %p1218_p1 }
  0x63   : > { %1228 = shalt.err (!%p1225_p9)
}
  0x64   : > { %s1229_s12 = scalar_lea.vmem %s1571_s16, 128  ;;  %s1390_s2 = smov [#allocation5]  }
  0x65   : > { %p1230_p12 = scmp.ne.s32.totalorder %s1571_s16, %s1229_s12  ;;  %s1234_s19 = sshll.u32 %s1390_s2, 4  ;;  %s1235_s19 = int_to_ptr.vmem [resolvable:$false] %s1234_s19 }
  0x66   : > { %s1236_s11 = scalar_lea.vmem %s1235_s19, 256  ;;  %p1237_p4 = scmp.lt.s32.totalorder %s1571_s16, %s1235_s19 }
  0x67   : > { %p1232_p2 = pnand %p1230_p12, %p1216_p0  ;;  %p1238_p13 = scmp.lt.s32.totalorder %s1236_s11, %s1229_s12 }
  0x69   : > { %p1233_p5 = pneg %p1232_p2  ;;  %p1239_p6 = por %p1238_p13, %p1237_p4 }
  0x6b   : > { %p1240_p10 = pnand %p1239_p6, %p1233_p5 }
  0x6d   : > { %1243 = shalt.err (!%p1240_p10)
}
  0x6e   : > { %1092 = dma.hbm_to_vmem [thread:$0]  (!%p1573_p11), %s1568_s14, 128, %s1571_s16, %s245_s20  }
  0x6f   : > { %s266_s3 = scalar_lea.vmem [#allocation8], %s1562_s10  ;;  %s263_s13 = scalar_lea.sflag [#allocation9], %s262_s30 }
  0x70   : > { %s273_s18 = sshll.u32 %s266_s3, 4  ;;  %s1244_s15 = scalar_lea.hbm %s1580_s8, 128  ;;  %s274_s18 = int_to_ptr.vmem [resolvable:$true] %s273_s18 }
  0x71   : > { %p1245_p4 = scmp.ne.s32.totalorder %s1580_s8, %s1244_s15  ;;  %s1249_s2 = scalar_lea.hbm %s1757_s1, 256 }
  0x72   : > { %p1250_p3 = scmp.lt.u32.totalorder %s1580_s8, %s1757_s1  ;;  %p1251_p7 = scmp.lt.u32.totalorder %s1249_s2, %s1244_s15 }
  0x73   : > { %p1247_p5 = pnand %p1245_p4, %p1216_p0  ;;  %p1253_p12 = scmp.lt.u32.totalorder %s1244_s15, %s1580_s8 }
  0x74   : > { %p1252_p9 = por %p1251_p7, %p1250_p3 }
  0x75   : > { %p1248_p1 = pneg %p1247_p5 }
  0x76   : > { %p1254_p2 = por %p1253_p12, %p1252_p9 }
  0x78   : > { %p1255_p13 = pnand %p1254_p2, %p1248_p1 }
  0x7a   : > { %1258 = shalt.err (!%p1255_p13)
}
  0x7b   : > { %s1259_s10 = scalar_lea.vmem %s274_s18, 128  ;;  %s1391_s14 = smov [#allocation8]  }
  0x7c   : > { %p1260_p6 = scmp.ne.s32.totalorder %s274_s18, %s1259_s10  ;;  %s1264_s16 = sshll.u32 %s1391_s14, 4  ;;  %s1265_s16 = int_to_ptr.vmem [resolvable:$false] %s1264_s16 }
  0x7d   : > { %s1266_s30 = scalar_lea.vmem %s1265_s16, 256  ;;  %p1267_p5 = scmp.lt.s32.totalorder %s274_s18, %s1265_s16 }
  0x7e   : > { %p1262_p10 = pnand %p1260_p6, %p1216_p0  ;;  %p1268_p8 = scmp.lt.s32.totalorder %s1266_s30, %s1259_s10 }
  0x80   : > { %p1263_p4 = pneg %p1262_p10  ;;  %p1269_p3 = por %p1268_p8, %p1267_p5 }
  0x82   : > { %p1270_p7 = pnand %p1269_p3, %p1263_p4 }
  0x84   : > { %1273 = shalt.err (!%p1270_p7)
}
  0x85   : > { %1095 = dma.hbm_to_vmem [thread:$0]  (!%p1573_p11), %s1580_s8, 128, %s274_s18, %s263_s13  }
  0x86   : > { %p1779_p1 = scmp.ne.s32.totalorder %s1771_s29, 0 }
  0x87   : > { %s1633_s20 = sand.u32 (!%p1779_p1), 1, %s1376_s22   ;;  %p1780_p8 = scmp.ne.s32.totalorder (!%p1779_p1), %s1769_s27, 0 }
  0x88   : > { %282 = sbr.rel (%p1779_p1) target bundleno = 1294 (0x50e), region = 40  ;;  %s1636_s3 = sshll.u32 (!%p1779_p1), %s1633_s20, 3 }
  0x89   : > { %s285_s15 = scalar_lea.sflag (!%p1779_p1), [#allocation6], %s1633_s20  ;;  %s288_s17 = scalar_lea.vmem (!%p1779_p1), [#allocation5], %s1636_s3 }
  0x8f   : > { %1347 = dma.done.wait (%p1780_p8), %s285_s15, 128  }
  0x90   : > { %1349 = vsyncadd (%p1780_p8), %s285_s15, 4294967168  ;;  %s293_s29 = sand.u32 1, %s1454_s25   ;;  %s297_s8 = scalar_lea.vmem [#allocation8], %s1636_s3 }
  0x91   : > { %s294_s7 = scalar_lea.sflag [#allocation9], %s293_s29 }
  0x92   : > { %1351 = dma.done.wait (%p1780_p8), %s294_s7, 128  }
  0x93   : > { %1353 = vsyncadd (%p1780_p8), %s294_s7, 4294967168  ;;  %p1781_p11 = scmp.eq.s32.totalorder %s1454_s25, 0 }
  0x95   : > { %1355 = dma.done.wait (%p1781_p11), [#allocation9], 512   ;;  %p1782_p0 = pmov %p1781_p11 }
  0x97   : > { %1357 = vsyncadd (%p1782_p0), [#allocation9], 4294966784  ;;  %p1783_p9 = pmov %p1782_p0 }
  0x98   : > { %p1784_p12 = pmov %p1782_p0 }
  0x99   : > { %1359 = dma.done.wait (%p1783_p9), [#allocation12], 512  }
  0x9a   : > { %1361 = vsyncadd (%p1784_p12), [#allocation12], 4294966784  ;;  %v1392_v0 = vmov 0.0|0.0   ;;  %vm1393_vm0 = vmmov 0   ;;  %v1394_v1 = vmov 0.0   ;;  %v425_v2 = vld [vmem:[#allocation11] sm:$0xff]  ;;  %v581_v22 = vlaneseq }
  0x9b   : > { %1060 = vmatprep.subr.bf16.mxu1 %v1392_v0  ;;  %1036 = vmatprep.mubr.msk.f32.mxu1 %vm1393_vm0, %v1394_v1  ;;  %v426_v3 = vld [vmem:[#allocation11 + $0x8] sm:$0xff]  ;;  %v427_v4 = vld [vmem:[#allocation11 + $0x10] sm:$0xff]  ;;  %v428_v6 = vld [vmem:[#allocation11 + $0x18] sm:$0xff]  ;;  %vm350_vm1 = vcmask 261120   ;;  %v1395_v16 = vmov 32   ;;  %vm589_vm3 = vcmask 64512  }
  0x9c   : > { %1054 = vmatprep.subr.bf16.mxu0 %v1392_v0  ;;  %1025 = vmatprep.mubr.msk.f32.mxu0 %vm1393_vm0, %v1394_v1  ;;  %v1061_v5 = vpack.c.bf16 %v426_v3, %v425_v2  ;;  %v346_v7 = vld [vmem:[#allocation10] sm:$0xff]  ;;  %v347_v8 = vld [vmem:[#allocation10 + $0x8] sm:$0xff]  ;;  %v348_v9 = vld [vmem:[#allocation10 + $0x10] sm:$0xff]  ;;  %v1064_v11 = vpack.c.bf16 %v428_v6, %v427_v4  ;;  %v582_v23 = vshrl.u32 %v581_v22, 7  ;;  %s336_s13 = scalar_lea.vmem [#allocation13], %s1636_s3  ;;  %s997_s12 = sshll.u32 %s1454_s25, 7 }
  0x9d   : > { %v349_v10 = vld [vmem:[#allocation10 + $0x18] sm:$0xff]  ;;  %v1055_v12 = vpack.c.bf16 %v347_v8, %v346_v7  ;;  %v344_v15 = vld [vmem:[%s288_s17] sm:$0xff]  ;;  %1149 = vset.pattern.permute.xlu0 %v1395_v16  ;;  %s1685_s11 = scalar_lea.hbm %s1761_s5, %s997_s12  ;;  %s816_s10 = sshll.u32 %s336_s13, 4  ;;  %s817_s10 = int_to_ptr.vmem [resolvable:$true] %s816_s10 }
  0x9e   : > { %1062 = vmatpush3.bf16.msra.mxu1 %v1061_v5  ;;  %v1058_v13 = vpack.c.bf16 %v349_v10, %v348_v9  ;;  %v345_v14 = vld [vmem:[%s297_s8] sm:$0xff]  ;;  %v583_v24 = vsub.s32 0, %v582_v23  ;;  %s798_s14 = scalar_lea.sflag [#allocation7], %s1633_s20  ;;  %s1274_s16 = scalar_lea.vmem %s817_s10, 128 }
  0x9f   : > { %1063 = vmatprep.subr.bf16.mxu1 %v1392_v0  ;;  %1056 = vmatpush3.bf16.msra.mxu0 %v1055_v12  ;;  %v504_v19 = vld [vmem:[%s1760_s4] sm:$0x1]  ;;  %p1275_p2 = scmp.ne.s32.totalorder %s817_s10, %s1274_s16  ;;  %p1785_p13 = scmp.ne.s32.totalorder %s1776_s9, 0 }
  0xa0   : > { %1057 = vmatprep.subr.bf16.mxu0 %v1392_v0  ;;  %s1396_s30 = smov [#allocation13]  }
  0xa1   : > { %p1276_p6 = pnand %p1275_p2, %p1785_p13  ;;  %s1278_s15 = sshll.u32 %s1396_s30, 4  ;;  %s1279_s15 = int_to_ptr.vmem [resolvable:$false] %s1278_s15 }
  0xa2   : > { %1065 = vmatpush3.bf16.msra.mxu1 %v1064_v11  ;;  %s1280_s17 = scalar_lea.vmem %s1279_s15, 256  ;;  %p1281_p4 = scmp.lt.s32.totalorder %s817_s10, %s1279_s15 }
  0xa3   : > { %1044 = vmatprep.subr.mxu1 %v1394_v1  ;;  %1059 = vmatpush3.bf16.msra.mxu0 %v1058_v13  ;;  %p1277_p10 = pneg %p1276_p6  ;;  %p1282_p5 = scmp.lt.s32.totalorder %s1280_s17, %s1274_s16 }
  0xa4   : > { %1039 = vmatprep.subr.mxu0 %v1394_v1 }
  0xa5   : > { %1037 = vmatmul.mubr.msk.f32.vlgmr.msra.gmra.mrb[0].mxu1 %vm350_vm1, %v345_v14  ;;  %p1283_p3 = por %p1282_p5, %p1281_p4 }
  0xa6   : > { %1046 = vmatprep.mubr.msk.f32.mxu1 %vm1393_vm0, %v1394_v1  ;;  %1026 = vmatmul.mubr.msk.f32.vlgmr.msra.gmra.mrb[0].mxu0 %vm350_vm1, %v344_v15 }
  0xa7   : > { %1041 = vmatprep.mubr.msk.f32.mxu0 %vm1393_vm0, %v1394_v1  ;;  %p1284_p7 = pnand %p1283_p3, %p1277_p10 }
 0x178   : > { %v498_v17 = vpop.f32.mrb[0].mxu1 }
 0x179   : > { %v1038_v18 = vpop.f32.mrb[1].mxu1  ;;  %1040 = vmatpush3.xpose.msra.mxu0 %v498_v17  ;;  %1045 = vmatpush3.msra.mxu1 %v498_v17  ;;  %v420_v20 = vpop.f32.mrb[0].mxu0 }
 0x17a   : > { %1049 = vmatprep.subr.mxu0 %v1394_v1  ;;  %578 = vperm.xlu0 %1149, %v420_v20   ;;  %v1027_v21 = vpop.f32.mrb[1].mxu0 }
 0x17c   : > { %1042 = vmatmul.mubr.f32.vlgmr.msra.gmra.mrb[2].mxu0 %v504_v19 }
 0x17d   : > { %1050 = vmatpush3.msra.mxu0 %v420_v20  ;;  %1051 = vmatprep.mubr.msk.f32.mxu0 %vm1393_vm0, %v1394_v1 }
 0x1f9   : > { %v579_v26 = vpop.permute.xlu0 %578 }
 0x24f   : > { %v572_v25 = vpop.f32.mrb[2].mxu0 }
 0x250   : > { %v584_v27 = vrot.slane %v572_v25, %v583_v24  ;;  %v1043_v28 = vpop.f32.mrb[3].mxu0 }
 0x252   : > { %v585_v29 = vadd.f32 %v584_v27, %v579_v26 }
 0x254   : > { %v587_v30 = vmul.f32 0.2, %v585_v29  ;;  %vm586_vm2 = vcmp.gt.f32.partialorder %v585_v29, 0.0 }
 0x256   : > { %v588_v31 = vsel %vm586_vm2, %v585_v29, %v587_v30 }
 0x257   : > { %v590_v32 = vsel %vm589_vm3, %v588_v31, -inf }
 0x258   : > { %591 = vmax.xlane.f32.xlu0 %v590_v32 }
 0x2e5   : > { %v592_v33 = vpop.xlane.xlu0 %591 }
 0x2e6   : > { %v593_v34 = vsub.f32 %v588_v31, %v592_v33 }
 0x2e8   : > { %v594_v35 = vmul.f32 1.442695, %v593_v34 }
 0x2ea   : > { %1150 = vpow2.f32 %v594_v35 }
 0x2f4   : > { %v1151_v36 = vpop.eup %1150 }
 0x2f5   : > { %v596_v37 = vsel %vm589_vm3, %v1151_v36, 0.0 }
 0x2f6   : > { %597 = vadd.xlane.f32.xlu1 %v596_v37 }
 0x383   : > { %v598_v38 = vpop.xlane.xlu1 %597 }
 0x384   : > { %1152 = vrcp.f32 %v598_v38 }
 0x38e   : > { %v1153_v39 = vpop.eup %1152 }
 0x38f   : > { %v600_v40 = vmul.f32 %v1153_v39, %v1151_v36 }
 0x391   : > { %601 = vst.msk [vmem:[#allocation4] sm:$0xff] %vm589_vm3, %v600_v40 }
 0x398   : > { %v602_v41 = vld [vmem:[#allocation4] sm:$0xff] }
 0x399   : > { %678 = vxpose.xlu1.b32.start.end [1/1] (short) (narrow) %v602_v41, 8  ;;  %1047 = vmatmul.mubr.msk.f32.vlgmr.msra.gmra.mrb[2].mxu1 %vm589_vm3, %v602_v41 }
 0x419   : > { %v694_v42 = vpop.trf.xlu1 }
 0x41a   : > { %1052 = vmatmul.mubr.msk.f32.vlgmr.msra.gmra.mrb[4].mxu0 %vm589_vm3, %v694_v42 }
 0x46c   : > { %v674_v43 = vpop.f32.mrb[2].mxu1 }
 0x46d   : > { %v784_v44 = vmin.f32 %v674_v43, 0.0  ;;  %v1048_v45 = vpop.f32.mrb[3].mxu1  ;;  %vm783_vm4 = vcmp.gt.f32.partialorder %v674_v43, 0.0 }
 0x46f   : > { %v785_v46 = vmul.f32 1.442695, %v784_v44 }
 0x471   : > { %1154 = vpow2.f32 %v785_v46 }
 0x47b   : > { %v1155_v47 = vpop.eup %1154 }
 0x47c   : > { %v993_v48 = vadd.f32 -1.0, %v1155_v47 }
 0x47e   : > { %v788_v49 = vsel %vm783_vm4, %v674_v43, %v993_v48 }
 0x47f   : > { %789 = vst.msk [vmem:[%s336_s13] sm:$0xff] %vm350_vm1, %v788_v49 }
 0x480   : > { %1287 = shalt.err (!%p1284_p7)
}
 0x481   : > { %s1288_s29 = scalar_lea.hbm %s1685_s11, 128  ;;  %s1292_s27 = scalar_lea.hbm %s1761_s5, 256 }
 0x482   : > { %p1289_p1 = scmp.ne.s32.totalorder %s1685_s11, %s1288_s29  ;;  %p1293_p0 = scmp.lt.u32.totalorder %s1685_s11, %s1761_s5 }
 0x483   : > { %p1294_p9 = scmp.lt.u32.totalorder %s1292_s27, %s1288_s29  ;;  %p1296_p2 = scmp.lt.u32.totalorder %s1288_s29, %s1685_s11 }
 0x484   : > { %p1290_p8 = pnand %p1289_p1, %p1785_p13 }
 0x485   : > { %p1295_p12 = por %p1294_p9, %p1293_p0 }
 0x486   : > { %p1291_p11 = pneg %p1290_p8 }
 0x487   : > { %p1297_p6 = por %p1296_p2, %p1295_p12 }
 0x489   : > { %p1298_p10 = pnand %p1297_p6, %p1291_p11 }
 0x48b   : > { %1301 = shalt.err (!%p1298_p10)
}
 0x48c   : > { %1078 = dma.vmem_to_hbm [thread:$0]  (%p1785_p13), %s817_s10, 128, %s1685_s11, %s798_s14  }
 0x48d   : > { %s343_s2 = scalar_lea.vmem [#allocation14], %s1636_s3  ;;  %s1711_s15 = scalar_lea.hbm %s1762_s6, %s997_s12 }
 0x48e   : > { %s829_s19 = sshll.u32 %s343_s2, 4  ;;  %s803_s11 = scalar_lea.sflag [#allocation15], %s1633_s20  ;;  %s1713_s19 = int_to_ptr.vmem [resolvable:$true] %s829_s19 }
 0x48f   : > { %s1302_s3 = scalar_lea.vmem %s1713_s19, 128  ;;  %s1397_s25 = smov [#allocation14]  }
 0x490   : > { %p1303_p4 = scmp.ne.s32.totalorder %s1713_s19, %s1302_s3  ;;  %s1306_s10 = sshll.u32 %s1397_s25, 4  ;;  %s1307_s10 = int_to_ptr.vmem [resolvable:$false] %s1306_s10 }
 0x491   : > { %s1308_s14 = scalar_lea.vmem %s1307_s10, 256  ;;  %p1309_p7 = scmp.lt.s32.totalorder %s1713_s19, %s1307_s10 }
 0x492   : > { %p1304_p5 = pnand %p1303_p4, %p1785_p13  ;;  %p1310_p1 = scmp.lt.s32.totalorder %s1308_s14, %s1302_s3 }
 0x494   : > { %p1305_p3 = pneg %p1304_p5  ;;  %p1311_p8 = por %p1310_p1, %p1309_p7 }
 0x496   : > { %p1312_p11 = pnand %p1311_p8, %p1305_p3 }
 0x4ed   : > { %v779_v50 = vpop.f32.mrb[4].mxu0 }
 0x4ee   : > { %v791_v51 = vmin.f32 %v779_v50, 0.0  ;;  %v1053_v52 = vpop.f32.mrb[5].mxu0  ;;  %vm790_vm5 = vcmp.gt.f32.partialorder %v779_v50, 0.0 }
 0x4f0   : > { %v792_v53 = vmul.f32 1.442695, %v791_v51 }
 0x4f2   : > { %1156 = vpow2.f32 %v792_v53 }
 0x4fc   : > { %v1157_v54 = vpop.eup %1156 }
 0x4fd   : > { %v994_v55 = vadd.f32 -1.0, %v1157_v54 }
 0x4ff   : > { %v795_v56 = vsel %vm790_vm5, %v779_v50, %v994_v55 }
 0x500   : > { %796 = vst.msk [vmem:[%s343_s2] sm:$0xff] %vm350_vm1, %v795_v56 }
 0x501   : > { %1315 = shalt.err (!%p1312_p11)
}
 0x502   : > { %s1316_s20 = scalar_lea.hbm %s1711_s15, 128  ;;  %s1320_s29 = scalar_lea.hbm %s1762_s6, 256 }
 0x503   : > { %p1317_p0 = scmp.ne.s32.totalorder %s1711_s15, %s1316_s20  ;;  %p1321_p2 = scmp.lt.u32.totalorder %s1711_s15, %s1762_s6 }
 0x504   : > { %p1322_p6 = scmp.lt.u32.totalorder %s1320_s29, %s1316_s20  ;;  %p1324_p4 = scmp.lt.u32.totalorder %s1316_s20, %s1711_s15 }
 0x505   : > { %p1318_p9 = pnand %p1317_p0, %p1785_p13 }
 0x506   : > { %p1323_p10 = por %p1322_p6, %p1321_p2 }
 0x507   : > { %p1319_p12 = pneg %p1318_p9 }
 0x508   : > { %p1325_p5 = por %p1324_p4, %p1323_p10 }
 0x50a   : > { %p1326_p3 = pnand %p1325_p5, %p1319_p12 }
 0x50c   : > { %1329 = shalt.err (!%p1326_p3)
}
 0x50d   : > { %1079 = dma.vmem_to_hbm [thread:$0]  (%p1785_p13), %s1713_s19, 128, %s1711_s15, %s803_s11  }
 0x50e PF: > { %s841_s27 = sand.u32 1, %s1372_s21   ;;  %p1786_p7 = scmp.ne.s32.totalorder %s1770_s28, 0 }
 0x50f   : > { %p1787_p1 = scmp.ge.s32.totalorder %s1384_s24, 2  ;;  %s842_s18 = scalar_lea.sflag [#allocation7], %s841_s27 }
 0x511   : > { %p1097_p8 = pnand %p1787_p1, %p1786_p7 }
 0x513   : > { %1363 = dma.done.wait (!%p1097_p8), %s842_s18, 128  }
 0x514   : > { %1365 = vsyncadd (!%p1097_p8), %s842_s18, 4294967168  ;;  %s851_s13 = scalar_lea.sflag [#allocation15], %s841_s27 }
 0x515   : > { %1367 = dma.done.wait (!%p1097_p8), %s851_s13, 128  }
 0x516   : > { %1369 = vsyncadd (!%p1097_p8), %s851_s13, 4294967168  ;;  %s1788_s9 = sld [smem:[#allocation22_spill]]  ;;  %p27_p13 = scmp.ge.s32.totalorder %s1543_s26, 4  }
 0x517   : > { %s1789_s21 = smov %s1376_s22  ;;  %s1790_s22 = smov %s1380_s23 }
 0x518   : > { %s1792_s24 = smov %s1543_s26  ;;  %29 = sbr.rel (!%p27_p13) target bundleno = 13 (0xd), region = 123 }
 0x51c   : > { %s1791_s23 = smov %s1788_s9 }
 0x51f   :  { %856 = vsyncpa [#allocation6], 1 }
 0x520   :  { %858 = vsyncpa [#allocation6 + $0x1], 1 }
 0x521   :  { %859 = vsyncpa [#allocation9], 1 }
 0x522   :  { %861 = vsyncpa [#allocation9 + $0x1], 1 }
 0x523   :  { %862 = vsyncpa [#allocation12], 1 }
 0x524   :  { %863 = vsyncpa [#allocation7], 1 }
 0x525   :  { %865 = vsyncpa [#allocation7 + $0x1], 1 }
 0x526   :  { %866 = vsyncpa [#allocation15], 1 }
 0x527   :  { %868 = vsyncpa [#allocation15 + $0x1], 1 }

</bundles_post_ra>
